<compile_context>
chip_gen: v7x
topology: tpu7x:2x2x1
jax: 0.10.0
libtpu: 0.0.40
codegen_flags: <defaults>
</compile_context>

<pallas_src>
import jax
import jax.numpy as jnp
import numpy as np
from jax.experimental import pallas as pl
from jax.experimental.pallas import tpu as pltpu


# ----------------------------------------------------------------------------
# Primary forward (recommended path): plain JAX, no pallas_call overhead.
# ----------------------------------------------------------------------------
def beta_network_forward(params, x):
    """BetaNetwork.forward: returns the learnable scalar beta (x is ignored)."""
    del x  # unused by the module's forward, exactly as in the PyTorch spec
    return params["beta"][0, 0]  # 0-d result, matching torch's 0-d parameter


# ----------------------------------------------------------------------------
# Standalone Pallas kernel (kept for export/testing parity only).
# ----------------------------------------------------------------------------
def _beta_kernel(beta_ref, out_ref):
    # (1, 1) f32 scalar resident in SMEM; one sreg read + one sreg write.
    # No vector tile is allocated and no masked partial store is emitted.
    out_ref[0, 0] = beta_ref[0, 0]


def beta_network_forward_pallas(params, x):
    """Same semantics as beta_network_forward, routed through a Pallas kernel."""
    del x  # forward ignores x; passing it would only add a pointless DMA
    beta = params["beta"]  # (1, 1) float32 learnable parameter
    out = pl.pallas_call(
        _beta_kernel,
        out_shape=jax.ShapeDtypeStruct((1, 1), jnp.float32),
        # Scalar in SMEM (not a padded VMEM vreg tile).
        in_specs=[pl.BlockSpec(memory_space=pltpu.MemorySpace.SMEM)],
        out_specs=pl.BlockSpec(memory_space=pltpu.MemorySpace.SMEM),
        # Output aliases the input buffer: no extra HBM allocation/writeback.
        input_output_aliases={0: 0},
    )(beta)
    return out[0, 0]


def init_params():
    # nn.Parameter(torch.tensor(0.1)) -> stored as (1, 1) f32 so it maps cleanly
    # onto an SMEM scalar slot; the wrappers squeeze it back to a 0-d value.
    return {"beta": jnp.full((1, 1), 0.1, jnp.float32)}


def reference_forward(params, x):
    """Plain-JAX reference mirroring the PyTorch forward (returns beta)."""
    del x
    return params["beta"][0, 0]


if __name__ == "__main__":
    key = jax.random.PRNGKey(0)
    # Example input; BetaNetwork.forward ignores it, as in the PyTorch module.
    x = jax.random.normal(key, (8, 128), jnp.float32)

    params = init_params()

    # Recommended path (plain JAX).
    out_fast = jax.block_until_ready(beta_network_forward(params, x))

    # Parity path through the Pallas kernel.
    out_kernel = jax.block_until_ready(beta_network_forward_pallas(params, x))

    ref = reference_forward(params, x)
    assert out_fast.shape == ()
    assert out_kernel.shape == ()
    np.testing.assert_allclose(np.asarray(out_fast), np.asarray(ref), rtol=1e-6, atol=0.0)
    np.testing.assert_allclose(np.asarray(out_kernel), np.asarray(ref), rtol=1e-6, atol=0.0)
    np.testing.assert_allclose(np.asarray(out_kernel), 0.1, rtol=1e-6, atol=0.0)
    print("KERNEL_OK")
</pallas_src>

<mosaic_0001>
module attributes {stable_mosaic.version = 11 : i64} {
  func.func @_beta_kernel(%arg0: memref<1x1xf32, #tpu.memory_space<smem>>, %arg1: memref<1x1xf32, #tpu.memory_space<smem>>) attributes {dimension_semantics = [], scalar_prefetch = 0 : i64, scratch_operands = 0 : i64, tpu.core_type = #tpu.core_type<tc>} {
    %c0 = arith.constant 0 : index
    %c0_0 = arith.constant 0 : index
    %0 = memref.load %arg0[%c0, %c0_0] : memref<1x1xf32, #tpu.memory_space<smem>>
    %c0_1 = arith.constant 0 : index
    %c0_2 = arith.constant 0 : index
    %1 = memref.load %arg1[%c0_1, %c0_2] : memref<1x1xf32, #tpu.memory_space<smem>>
    memref.store %0, %arg1[%c0_1, %c0_2] : memref<1x1xf32, #tpu.memory_space<smem>>
    return
  }
}

</mosaic_0001>

<bundles_post_ra>
// kernel: tpu_custom_call.1
= control target key start
LH: loop header
LB: loop body
LE: loop exit
PB: predicated region body
PF: predicated region fallthrough
CT: control target
= control target key end

     0   :  { %7 = vsyncpa [#allocation4], 0  ;;  %s65_s0 = inlined_call_operand.<no memory space> [shape: f32[1,1], index: 0, kind: input, shape index: {}, may-alias: {0,1}]   ;;  %s66_s1 = inlined_call_operand.hbm [shape: f32[1,1], index: 1, kind: output, shape index: {}, may-alias: {0,1}]  }
   0x1   :  { %12 = sst [smem:[#allocation3]] %s65_s0  ;;  %s27_s10 = scalar_lea.hbm %s66_s1, 16 }
   0x2   :  { %p28_p0 = scmp.ne.s32.totalorder %s66_s1, %s27_s10  ;;  %p31_p1 = scmp.lt.u32.totalorder %s27_s10, %s66_s1 }
   0x4   :  { %p33_p2 = pnand %p31_p1, %p28_p0 }
   0x6   :  { %36 = shalt.err (!%p33_p2)
}
   0x7   :  { %s39_s15 = smov [#allocation3]  }
   0x8   :  { %20 = dma.smem_to_hbm %s39_s15, 16, %s66_s1, [#allocation4]  }
   0x9   :  { %37 = dma.done.wait [#allocation4], 16  }
   0xa   :  { %38 = vsyncadd [#allocation4], 4294967280 }
   0xb   :  { %24 = sfence }
   0xc   :  { %25 = vsyncpa [#allocation4], 1 }

</bundles_post_ra>
